<compile_context>
chip_gen: v7x
topology: tpu7x:2x2x1
jax: 0.10.0
libtpu: 0.0.40
codegen_flags: <defaults>
</compile_context>

<pallas_src>
import math
from functools import partial

import jax
import jax.numpy as jnp
from jax.experimental import pallas as pl
from jax.experimental.pallas import tpu as pltpu


# Lane-tile over the point axis. If N <= this, the whole axis is one block
# (no (8,128) constraint since it equals the full dim); otherwise tiles are a
# multiple of 128 lanes and N is zero-padded up to a multiple of the tile.
_MAX_LANE_TILE = 1024  # multiple of 128; sized well under v7x's 64 MiB VMEM


def _mlp_kernel(n_layers, x_ref, *refs):
    """Fused MLP kernel on one (batch, point-tile) block.

    refs layout: (w0, b0, w1, b1, ..., out_ref)
      x_ref : [1, Cin, TN]   (channels-major, points on lanes)
      w_i   : [Cout_i, Cin_i]
      b_i   : [Cout_i, 1]
      out   : [1, Cout, TN]
    Every layer is matmul + bias + ReLU (== Conv1d(k=1) + ReLU).
    """
    out_ref = refs[-1]
    param_refs = refs[:-1]

    h = x_ref[0].astype(jnp.float32)                 # [Cin, TN]
    for i in range(n_layers):
        w = param_refs[2 * i][...]                   # [Cout_i, Cin_i]
        b = param_refs[2 * i + 1][...]               # [Cout_i, 1]
        h = jnp.dot(w, h, preferred_element_type=jnp.float32)   # [Cout_i, TN]
        h = jnp.maximum(h + b, 0.0)                  # bias broadcast along lanes, ReLU
    out_ref[0] = h.astype(out_ref.dtype)


def mlp_forward_ncw(x, weights, biases):
    """x: [B, Cin, N] -> [B, Cout, N], all layers fused in one pallas_call."""
    B, Cin, N = x.shape
    n_layers = len(weights)
    Cout = weights[-1].shape[0]

    # Choose the lane tile and pad N if we have to tile it.
    TN = N if N <= _MAX_LANE_TILE else _MAX_LANE_TILE
    n_tiles = pl.cdiv(N, TN)
    N_pad = n_tiles * TN
    if N_pad != N:
        x = jnp.pad(x, ((0, 0), (0, 0), (0, N_pad - N)))

    grid = (B, n_tiles)

    operands = [x]
    in_specs = [pl.BlockSpec((1, Cin, TN), lambda b, i: (b, 0, i))]
    for w, bvec in zip(weights, biases):
        operands += [w, bvec]
        # Constant index maps => weights/biases stay VMEM-resident across the grid.
        in_specs += [
            pl.BlockSpec(w.shape, lambda b, i: (0, 0)),
            pl.BlockSpec(bvec.shape, lambda b, i: (0, 0)),
        ]

    itemsize = x.dtype.itemsize
    flops = 2 * B * N_pad * sum(int(w.shape[0]) * int(w.shape[1]) for w in weights)
    bytes_accessed = (
        x.size * itemsize
        + B * Cout * N_pad * itemsize
        + sum(w.size * w.dtype.itemsize for w in weights)
        + sum(bv.size * bv.dtype.itemsize for bv in biases)
    )

    out = pl.pallas_call(
        partial(_mlp_kernel, n_layers),
        out_shape=jax.ShapeDtypeStruct((B, Cout, N_pad), x.dtype),
        grid=grid,
        in_specs=in_specs,
        out_specs=pl.BlockSpec((1, Cout, TN), lambda b, i: (b, 0, i)),
        compiler_params=pltpu.CompilerParams(
            dimension_semantics=("parallel", "parallel")),
        cost_estimate=pl.CostEstimate(
            flops=flops, transcendentals=0, bytes_accessed=bytes_accessed),
    )(*operands)

    if N_pad != N:
        out = out[:, :, :N]
    return out


class MLPNetPallas:
    """JAX/Pallas equivalent of MLPNet(nch_input, nch_layers).

    [B, Cin, N] -> [B, Cout, N]   (b_shared=True, Conv1d k=1)
    [B, Cin]    -> [B, Cout]      (b_shared=False, Linear)
    Both reduce to the same fused matmul+bias+ReLU kernel.
    """

    def __init__(self, nch_input, nch_layers, b_shared=True, bn_momentum=0.1,
                 dropout=0.0, key=None):
        if key is None:
            key = jax.random.PRNGKey(0)
        self.b_shared = b_shared
        self.weights = []   # list of [Cout, Cin]  (channels-major)
        self.biases = []    # list of [Cout, 1]
        last = nch_input
        for outp in nch_layers:
            key, wk, bk = jax.random.split(key, 3)
            # PyTorch Conv1d/Linear default init: U(-1/sqrt(fan_in), 1/sqrt(fan_in))
            bound = 1.0 / math.sqrt(last)
            w = jax.random.uniform(wk, (outp, last), jnp.float32, -bound, bound)
            b = jax.random.uniform(bk, (outp, 1), jnp.float32, -bound, bound)
            self.weights.append(w)
            self.biases.append(b)
            last = outp
        # TODO(synk): dropout (inference no-op) and bn_momentum (unused in the
        # reference module's forward) are not implemented.

    def __call__(self, x):
        if x.ndim == 3:
            # Native NCW layout, no transposes needed.
            return mlp_forward_ncw(x, self.weights, self.biases)
        elif x.ndim == 2:
            # [B, Cin] -> view as one channels-major slab with B on the lanes.
            B, Cin = x.shape
            x3 = jnp.transpose(x, (1, 0))[None, :, :]          # [1, Cin, B]
            y3 = mlp_forward_ncw(x3, self.weights, self.biases)  # [1, Cout, B]
            return jnp.transpose(y3[0], (1, 0))                 # [B, Cout]
        else:
            raise ValueError("expected 2-D or 3-D input")


def _reference_forward(x, weights, biases):
    """Pure-JAX reference for correctness checking (NCW layout)."""
    h = x
    for w, b in zip(weights, biases):
        h = jnp.maximum(jnp.einsum("oc,bcn->bon", w, h) + b[None, :, :], 0.0)
    return h


if __name__ == "__main__":
    key = jax.random.PRNGKey(0)
    k_in, k_params = jax.random.split(key)

    # Small shapes consistent with the module: [B, Cin, N] with a 2-layer MLP.
    B, Cin, N = 2, 4, 16
    nch_layers = [32, 64]

    x = jax.random.normal(k_in, (B, Cin, N), jnp.float32)

    net = MLPNetPallas(Cin, nch_layers, b_shared=True, key=k_params)
    out = net(x)
    out = jax.block_until_ready(out)

    assert out.shape == (B, nch_layers[-1], N), out.shape

    ref = _reference_forward(x, net.weights, net.biases)
    assert jnp.allclose(out, ref, atol=1e-5, rtol=1e-5), "mismatch vs reference"

    # Also exercise the 2-D (Linear-style) path.
    x2 = jax.random.normal(k_in, (B, Cin), jnp.float32)
    out2 = jax.block_until_ready(net(x2))
    ref2 = jnp.transpose(
        _reference_forward(jnp.transpose(x2, (1, 0))[None], net.weights, net.biases)[0],
        (1, 0))
    assert out2.shape == (B, nch_layers[-1]), out2.shape
    assert jnp.allclose(out2, ref2, atol=1e-5, rtol=1e-5), "2-D path mismatch"

    print("KERNEL_OK")
</pallas_src>

<mosaic_0001>
module attributes {stable_mosaic.version = 11 : i64} {
  func.func @_mlp_kernel(%arg0: i32, %arg1: i32, %arg2: memref<1x4x16xf32, #tpu.memory_space<vmem>>, %arg3: memref<32x4xf32, #tpu.memory_space<vmem>>, %arg4: memref<32x1xf32, #tpu.memory_space<vmem>>, %arg5: memref<64x32xf32, #tpu.memory_space<vmem>>, %arg6: memref<64x1xf32, #tpu.memory_space<vmem>>, %arg7: memref<1x64x16xf32, #tpu.memory_space<vmem>>) attributes {dimension_semantics = [#tpu.dimension_semantics<parallel>, #tpu.dimension_semantics<parallel>], iteration_bounds = array<i64: 2, 1>, scalar_prefetch = 0 : i64, scratch_operands = 0 : i64, tpu.core_type = #tpu.core_type<tc>, window_params = [{transform_indices = @transform_0, window_bounds = array<i64: 1, 4, 16>}, {pipeline_mode = #tpu.pipeline_mode<synchronous>, transform_indices = @transform_1, window_bounds = array<i64: 32, 4>}, {pipeline_mode = #tpu.pipeline_mode<synchronous>, transform_indices = @transform_2, window_bounds = array<i64: 32, 1>}, {pipeline_mode = #tpu.pipeline_mode<synchronous>, transform_indices = @transform_3, window_bounds = array<i64: 64, 32>}, {pipeline_mode = #tpu.pipeline_mode<synchronous>, transform_indices = @transform_4, window_bounds = array<i64: 64, 1>}, {transform_indices = @transform_5, window_bounds = array<i64: 1, 64, 16>}]} {
    %c0 = arith.constant 0 : index
    %c0_0 = arith.constant 0 : index
    %c0_1 = arith.constant 0 : index
    %0 = vector.load %arg2[%c0, %c0_0, %c0_1] : memref<1x4x16xf32, #tpu.memory_space<vmem>>, vector<1x4x16xf32>
    %1 = vector.shape_cast %0 : vector<1x4x16xf32> to vector<4x16xf32>
    %c0_2 = arith.constant 0 : index
    %c0_3 = arith.constant 0 : index
    %2 = vector.load %arg3[%c0_2, %c0_3] : memref<32x4xf32, #tpu.memory_space<vmem>>, vector<32x4xf32>
    %c0_4 = arith.constant 0 : index
    %c0_5 = arith.constant 0 : index
    %3 = vector.load %arg4[%c0_4, %c0_5] : memref<32x1xf32, #tpu.memory_space<vmem>>, vector<32x1xf32>
    %cst = arith.constant dense<0.000000e+00> : vector<32x16xf32>
    %4 = tpu.matmul %2, %1, %cst {dimension_numbers = #tpu.dot_dimension_numbers<[1], [0], [0], [1], [0, 0, 1, 1], [], []>} : vector<32x4xf32>, vector<4x16xf32>, vector<32x16xf32> -> vector<32x16xf32>
    %5 = vector.broadcast %3 : vector<32x1xf32> to vector<32x16xf32>
    %6 = arith.addf %4, %5 : vector<32x16xf32>
    %cst_6 = arith.constant 0.000000e+00 : f32
    %7 = vector.broadcast %cst_6 : f32 to vector<32x16xf32>
    %8 = arith.maximumf %6, %7 : vector<32x16xf32>
    %c0_7 = arith.constant 0 : index
    %c0_8 = arith.constant 0 : index
    %9 = vector.load %arg5[%c0_7, %c0_8] : memref<64x32xf32, #tpu.memory_space<vmem>>, vector<64x32xf32>
    %c0_9 = arith.constant 0 : index
    %c0_10 = arith.constant 0 : index
    %10 = vector.load %arg6[%c0_9, %c0_10] : memref<64x1xf32, #tpu.memory_space<vmem>>, vector<64x1xf32>
    %cst_11 = arith.constant dense<0.000000e+00> : vector<64x16xf32>
    %11 = tpu.matmul %9, %8, %cst_11 {dimension_numbers = #tpu.dot_dimension_numbers<[1], [0], [0], [1], [0, 0, 1, 1], [], []>} : vector<64x32xf32>, vector<32x16xf32>, vector<64x16xf32> -> vector<64x16xf32>
    %12 = vector.broadcast %10 : vector<64x1xf32> to vector<64x16xf32>
    %13 = arith.addf %11, %12 : vector<64x16xf32>
    %cst_12 = arith.constant 0.000000e+00 : f32
    %14 = vector.broadcast %cst_12 : f32 to vector<64x16xf32>
    %15 = arith.maximumf %13, %14 : vector<64x16xf32>
    %c0_13 = arith.constant 0 : index
    %c0_14 = arith.constant 0 : index
    %c0_15 = arith.constant 0 : index
    %16 = vector.load %arg7[%c0_13, %c0_14, %c0_15] : memref<1x64x16xf32, #tpu.memory_space<vmem>>, vector<1x64x16xf32>
    %17 = vector.shape_cast %16 : vector<1x64x16xf32> to vector<64x16xf32>
    %18 = vector.shape_cast %15 : vector<64x16xf32> to vector<1x64x16xf32>
    tpu.vector_store %arg7[%c0_13, %c0_14, %c0_15], %18 {strides = array<i32>} : memref<1x64x16xf32, #tpu.memory_space<vmem>>, vector<1x64x16xf32>,
    return
  }
  func.func @transform_0(%arg0: i32, %arg1: i32) -> (i32, i32, i32) {
    %c0_i32 = arith.constant 0 : i32
    %c0_i32_0 = arith.constant 0 : i32
    return %arg0, %c0_i32, %arg1 : i32, i32, i32
  }
  func.func @transform_1(%arg0: i32, %arg1: i32) -> (i32, i32) {
    %c0_i32 = arith.constant 0 : i32
    %c0_i32_0 = arith.constant 0 : i32
    %c0_i32_1 = arith.constant 0 : i32
    return %c0_i32, %c0_i32_0 : i32, i32
  }
  func.func @transform_2(%arg0: i32, %arg1: i32) -> (i32, i32) {
    %c0_i32 = arith.constant 0 : i32
    %c0_i32_0 = arith.constant 0 : i32
    %c0_i32_1 = arith.constant 0 : i32
    return %c0_i32, %c0_i32_0 : i32, i32
  }
  func.func @transform_3(%arg0: i32, %arg1: i32) -> (i32, i32) {
    %c0_i32 = arith.constant 0 : i32
    %c0_i32_0 = arith.constant 0 : i32
    %c0_i32_1 = arith.constant 0 : i32
    return %c0_i32, %c0_i32_0 : i32, i32
  }
  func.func @transform_4(%arg0: i32, %arg1: i32) -> (i32, i32) {
    %c0_i32 = arith.constant 0 : i32
    %c0_i32_0 = arith.constant 0 : i32
    %c0_i32_1 = arith.constant 0 : i32
    return %c0_i32, %c0_i32_0 : i32, i32
  }
  func.func @transform_5(%arg0: i32, %arg1: i32) -> (i32, i32, i32) {
    %c0_i32 = arith.constant 0 : i32
    %c0_i32_0 = arith.constant 0 : i32
    return %arg0, %c0_i32, %arg1 : i32, i32, i32
  }
}

</mosaic_0001>

<bundles_post_ra>
// kernel: tpu_custom_call.1
= control target key start
LH: loop header
LB: loop body
LE: loop exit
PB: predicated region body
PF: predicated region fallthrough
CT: control target
= control target key end

     0   :  { %s834_s18 = smov 0   ;;  %s836_s19 = smov 0   ;;  %s973_s0 = inlined_call_operand.vmem [shape: f32[2,4,16], index: 0, kind: input, shape index: {}]   ;;  %s974_s1 = inlined_call_operand.vmem [shape: f32[32,4], index: 1, kind: input, shape index: {}]   ;;  %s975_s2 = inlined_call_operand.vmem [shape: f32[32,1], index: 2, kind: input, shape index: {}]   ;;  %s976_s3 = inlined_call_operand.vmem [shape: f32[64,32], index: 3, kind: input, shape index: {}]   ;;  %s977_s4 = inlined_call_operand.vmem [shape: f32[64,1], index: 4, kind: input, shape index: {}]   ;;  %s978_s5 = inlined_call_operand.vmem [shape: f32[2,64,16], index: 5, kind: output, shape index: {}]  }
   0x1   :  { %s838_s20 = smov 0  }
   0x2 LB: > { %s27_s21 = sadd.s32 1, %s797_s19  ;;  %p675_p0 = scmp.ge.s32.totalorder %s801_s20, 1  ;;  %s801_s20 = sphi %s838_s20, %s15_s20   ;;  %s797_s19 = sphi %s836_s19, %s980_s19   ;;  %s793_s18 = sphi %s834_s18, %s979_s18  }
   0x3   : > { %p29_p1 = scmp.ge.s32.totalorder %s27_s21, 2  ;;  %p205_p2 = scmp.lt.s32.totalorder %s801_s20, 3 }
   0x5   : > { %s982_s21 = smov (%p29_p1, %s27_s21), 0  ;;  %p206_p3 = pnand %p675_p0, %p205_p2 }
   0x6   : > { %p238_p4 = scmp.lt.s32.totalorder (!%p206_p3), %s793_s18, 1  ;;  %v254_v0 = vld [vmem:[%s974_s1] sm:$0xff] (!%p206_p3)  ;;  %vm282_vm0 = vcmask (!%p206_p3), 31744   ;;  %v260_v2 = vld [vmem:[%s975_s2 + $0x10] sm:$0xff] (!%p206_p3)  ;;  %v803_v3 = vmov (!%p206_p3), 0   ;;  %vm295_vm1 = vcmask (!%p206_p3), 1043456  }
   0x7   : > { %209 = sbr.rel (%p206_p3) target bundleno = 473 (0x1d9), region = 40  ;;  %714 = vmatprep.mubr.msk.f32.mxu0 (!%p206_p3), %vm282_vm0, %v254_v0  ;;  %v258_v1 = vld [vmem:[%s975_s2] sm:$0xff] (!%p206_p3)  ;;  %777 = vset.pattern.permute.xlu0 (!%p206_p3), %v803_v3  ;;  %v259_v4 = vld [vmem:[%s975_s2 + $0x8] sm:$0xff] (!%p206_p3)  ;;  %v261_v5 = vld [vmem:[%s975_s2 + $0x18] sm:$0xff] (!%p206_p3)  ;;  %vm444_vm2 = vcmask (!%p206_p3), 261120   ;;  %vm582_vm3 = vcmask (!%p206_p3), 130048  }
   0x8   : > { %778 = vset.pattern.permute.xlu1 (!%p206_p3), %v803_v3  ;;  %264 = vperm.xlu0 (!%p206_p3), %777, %v258_v1   ;;  %v255_v7 = vld [vmem:[%s974_s1 + $0x8] sm:$0xff] (!%p206_p3)  ;;  %v256_v8 = vld [vmem:[%s974_s1 + $0x10] sm:$0xff] (!%p206_p3)  ;;  %v396_v9 = vld [vmem:[%s977_s4] sm:$0xff] (!%p206_p3) }
   0x9   : > { %274 = vperm.xlu1 (!%p206_p3), %778, %v260_v2   ;;  %v397_v10 = vld [vmem:[%s977_s4 + $0x8] sm:$0xff] (!%p206_p3)  ;;  %v257_v11 = vld [vmem:[%s974_s1 + $0x18] sm:$0xff] (!%p206_p3)  ;;  %v398_v12 = vld [vmem:[%s977_s4 + $0x10] sm:$0xff] (!%p206_p3) }
   0xa   : > { %v399_v13 = vld [vmem:[%s977_s4 + $0x18] sm:$0xff] (!%p206_p3)  ;;  %v400_v14 = vld [vmem:[%s977_s4 + $0x20] sm:$0xff] (!%p206_p3)  ;;  %v401_v15 = vld [vmem:[%s977_s4 + $0x28] sm:$0xff] (!%p206_p3) }
   0xb   : > { %v402_v16 = vld [vmem:[%s977_s4 + $0x30] sm:$0xff] (!%p206_p3)  ;;  %v403_v17 = vld [vmem:[%s977_s4 + $0x38] sm:$0xff] (!%p206_p3)  ;;  %v388_v18 = vld [vmem:[%s976_s3] sm:$0xff] (!%p206_p3) }
   0xc   : > { %269 = vperm.xlu0 (!%p206_p3), %777, %v259_v4   ;;  %v390_v19 = vld [vmem:[%s976_s3 + $0x10] sm:$0xff] (!%p206_p3)  ;;  %v389_v38 = vld [vmem:[%s976_s3 + $0x8] sm:$0xff] (!%p206_p3)  ;;  %v391_v39 = vld [vmem:[%s976_s3 + $0x18] sm:$0xff] (!%p206_p3) }
   0xd   : > { %279 = vperm.xlu1 (!%p206_p3), %778, %v261_v5   ;;  %731 = vmatprep.mubr.msk.f32.mxu1 (!%p206_p3), %vm444_vm2, %v390_v19  ;;  %v392_v40 = vld [vmem:[%s976_s3 + $0x20] sm:$0xff] (!%p206_p3)  ;;  %v393_v41 = vld [vmem:[%s976_s3 + $0x28] sm:$0xff] (!%p206_p3)  ;;  %v394_v42 = vld [vmem:[%s976_s3 + $0x30] sm:$0xff] (!%p206_p3) }
   0xe   : > { %s984_s18 = smov (!%p238_p4, %s793_s18), 1  ;;  %v395_v43 = vld [vmem:[%s976_s3 + $0x38] sm:$0xff] }
   0xf   : > { %s676_s28 = sshll.u32 %s984_s18, 2  ;;  %s694_s7 = sshll.u32 %s984_s18, 6 }
  0x10   : > { %s244_s8 = scalar_lea.vmem %s973_s0, %s676_s28  ;;  %406 = vperm.xlu0 %777, %v396_v9   ;;  %s946_s10 = scalar_lea.vmem %s978_s5, %s694_s7 }
  0x11   : > { %v253_v6 = vld [vmem:[%s244_s8] sm:$0xf]  ;;  %411 = vperm.xlu1 %778, %v397_v10  }
  0x12   : > { %712 = vmatprep.subr.msk.mxu0 %vm295_vm1, %v253_v6 }
  0x13   : > { %713 = vmatpush3.msk.msra.mxu0 %vm295_vm1, %v253_v6 }
  0x14   : > { %715 = vmatmul.mubr.msk.f32.vlgmr.msra.gmra.mrb[0].mxu0 %vm282_vm0, %v255_v7  ;;  %416 = vperm.xlu0 %777, %v398_v12  }
  0x15   : > { %717 = vmatprep.mubr.msk.f32.mxu0 %vm282_vm0, %v256_v8  ;;  %421 = vperm.xlu1 %778, %v399_v13  }
  0x18   : > { %718 = vmatmul.mubr.msk.f32.gmra.mrb[2].mxu0 %vm282_vm0, %v257_v11  ;;  %426 = vperm.xlu0 %777, %v400_v14  }
  0x19   : > { %431 = vperm.xlu1 %778, %v401_v15   ;;  %728 = vmatprep.mubr.msk.f32.mxu0 %vm444_vm2, %v388_v18 }
  0x1c   : > { %436 = vperm.xlu0 %777, %v402_v16  }
  0x1d   : > { %441 = vperm.xlu1 %778, %v403_v17  }
  0x87   : > { %v265_v20 = vpop.permute.xlu0 %264 }
  0x88   : > { %v275_v21 = vpop.permute.xlu1 %274 }
  0x8b   : > { %v270_v22 = vpop.permute.xlu0 %269 }
  0x8c   : > { %v280_v28 = vpop.permute.xlu1 %279 }
  0x8f   : > { %v407_v45 = vpop.permute.xlu0 %406 }
  0x90   : > { %v412_v44 = vpop.permute.xlu1 %411 }
  0x93   : > { %v417_v47 = vpop.permute.xlu0 %416 }
  0x94   : > { %v422_v46 = vpop.permute.xlu1 %421 }
  0x97   : > { %v427_v57 = vpop.permute.xlu0 %426 }
  0x98   : > { %v432_v54 = vpop.permute.xlu1 %431 }
  0x9b   : > { %v437_v6 = vpop.permute.xlu0 %436 }
  0x9c   : > { %v442_v3 = vpop.permute.xlu1 %441 }
  0xe7   : > { %v716_v23 = vpop.f32.mrb[0].mxu0 }
  0xe8   : > { %v371_v24 = vadd.f32 %v716_v23, %v270_v22  ;;  %v365_v25 = vpop.f32.mrb[1].mxu0 }
  0xe9   : > { %v366_v26 = vadd.f32 %v365_v25, %v265_v20 }
  0xea   : > { %v385_v27 = vmax.f32 %v371_v24, 0.0 }
  0xeb   : > { %v384_v29 = vmax.f32 %v366_v26, 0.0  ;;  %v719_v30 = vpop.f32.mrb[2].mxu0 }
  0xec   : > { %v381_v31 = vadd.f32 %v719_v30, %v280_v28  ;;  %v375_v32 = vpop.f32.mrb[3].mxu0 }
  0xed   : > { %v740_v33 = vpack.c.bf16 %v385_v27, %v384_v29  ;;  %v376_v34 = vadd.f32 %v375_v32, %v275_v21 }
  0xee   : > { %v387_v35 = vmax.f32 %v381_v31, 0.0 }
  0xef   : > { %v386_v36 = vmax.f32 %v376_v34, 0.0  ;;  %741 = vmatprep.subr.bf16.mxu0 %v740_v33  ;;  %748 = vmatprep.subr.bf16.mxu1 %v740_v33 }
  0xf0   : > { %743 = vmatpush3.bf16.msra.mxu0 %v740_v33  ;;  %750 = vmatpush3.bf16.msra.mxu1 %v740_v33 }
  0xf1   : > { %v744_v37 = vpack.c.bf16 %v387_v35, %v386_v36 }
  0xf3   : > { %745 = vmatprep.subr.bf16.mxu0 %v744_v37  ;;  %749 = vmatprep.subr.bf16.mxu1 %v744_v37 }
  0xf4   : > { %747 = vmatpush3.bf16.msra.mxu0 %v744_v37  ;;  %751 = vmatpush3.bf16.msra.mxu1 %v744_v37 }
  0xf7   : > { %729 = vmatmul.mubr.msk.f32.vlgmr.msra.gmra.mrb[4].mxu0 %vm444_vm2, %v389_v38  ;;  %732 = vmatmul.mubr.msk.f32.vlgmr.msra.gmra.mrb[0].mxu1 %vm444_vm2, %v391_v39 }
  0xf8   : > { %734 = vmatprep.mubr.msk.f32.mxu1 %vm444_vm2, %v392_v40 }
  0xfb   : > { %735 = vmatmul.mubr.msk.f32.gmra.mrb[2].mxu1 %vm444_vm2, %v393_v41 }
  0xfc   : > { %737 = vmatprep.mubr.msk.f32.mxu1 %vm444_vm2, %v394_v42 }
  0xff   : > { %738 = vmatmul.mubr.msk.f32.gmra.mrb[4].mxu1 %vm444_vm2, %v395_v43 }
 0x1ca   : > { %v730_v48 = vpop.f32.mrb[4].mxu0  ;;  %v733_v49 = vpop.f32.mrb[0].mxu1 }
 0x1cb   : > { %v541_v50 = vadd.f32 %v730_v48, %v412_v44  ;;  %v551_v51 = vadd.f32 %v733_v49, %v422_v46  ;;  %v535_v52 = vpop.f32.mrb[5].mxu0  ;;  %v545_v53 = vpop.f32.mrb[1].mxu1 }
 0x1cc   : > { %v536_v55 = vadd.f32 %v535_v52, %v407_v45  ;;  %v546_v56 = vadd.f32 %v545_v53, %v417_v47 }
 0x1cd   : > { %v575_v58 = vmax.f32 %v541_v50, 0.0  ;;  %v577_v59 = vmax.f32 %v551_v51, 0.0 }
 0x1ce   : > { %v574_v60 = vmax.f32 %v536_v55, 0.0  ;;  %v576_v61 = vmax.f32 %v546_v56, 0.0  ;;  %v736_v62 = vpop.f32.mrb[2].mxu1 }
 0x1cf   : > { %584 = vst.msk [vmem:[%s946_s10 + $0x8] sm:$0xff] %vm582_vm3, %v575_v58  ;;  %586 = vst.msk [vmem:[%s946_s10 + $0x18] sm:$0xff] %vm582_vm3, %v577_v59  ;;  %v561_v63 = vadd.f32 %v736_v62, %v432_v54  ;;  %v555_v0 = vpop.f32.mrb[3].mxu1 }
 0x1d0   : > { %583 = vst.msk [vmem:[%s946_s10] sm:$0xff] %vm582_vm3, %v574_v60  ;;  %585 = vst.msk [vmem:[%s946_s10 + $0x10] sm:$0xff] %vm582_vm3, %v576_v61  ;;  %v556_v1 = vadd.f32 %v555_v0, %v427_v57 }
 0x1d1   : > { %v579_v2 = vmax.f32 %v561_v63, 0.0 }
 0x1d2   : > { %v578_v4 = vmax.f32 %v556_v1, 0.0  ;;  %v739_v5 = vpop.f32.mrb[4].mxu1 }
 0x1d3   : > { %588 = vst.msk [vmem:[%s946_s10 + $0x28] sm:$0xff] %vm582_vm3, %v579_v2  ;;  %v571_v7 = vadd.f32 %v739_v5, %v442_v3  ;;  %v565_v8 = vpop.f32.mrb[5].mxu1 }
 0x1d4   : > { %587 = vst.msk [vmem:[%s946_s10 + $0x20] sm:$0xff] %vm582_vm3, %v578_v4  ;;  %v566_v9 = vadd.f32 %v565_v8, %v437_v6 }
 0x1d5   : > { %v581_v10 = vmax.f32 %v571_v7, 0.0 }
 0x1d6   : > { %v580_v11 = vmax.f32 %v566_v9, 0.0 }
 0x1d7   : > { %590 = vst.msk [vmem:[%s946_s10 + $0x38] sm:$0xff] %vm582_vm3, %v581_v10 }
 0x1d8   : > { %589 = vst.msk [vmem:[%s946_s10 + $0x30] sm:$0xff] %vm582_vm3, %v580_v11 }
 0x1d9 PF: > { %s15_s20 = sadd.s32 1, %s801_s20   ;;  %s979_s18 = smov %s797_s19 }
 0x1da   : > { %p12_p5 = scmp.ge.s32.totalorder %s15_s20, 4   ;;  %s980_s19 = smov %s982_s21 }
 0x1dc   :  { %14 = sbr.rel (!%p12_p5) target bundleno = 2 (0x2), region = 70 }

</bundles_post_ra>
